<compile_context>
chip_gen: v7x
topology: tpu7x:2x2x1
jax: 0.10.0
libtpu: 0.0.40
codegen_flags: <defaults>
</compile_context>

<pallas_src>
import functools
import math

import jax
import jax.numpy as jnp
from jax.experimental import pallas as pl
from jax.experimental.pallas import tpu as pltpu

# ----------------------------------------------------------------------------- config
D_MODEL = 32          # attention dim (hidden_size)
NUM_HEADS = 4
D_FF = 64             # feed-forward linear units
CNN_KERNEL = 15       # conv-module depthwise kernel (odd -> 'same' padding)
NUM_LAYERS = 2
LN_EPS = 1e-12        # espnet LayerNorm eps
BN_EPS = 1e-5

# Raw (torch-like) per-layer parameter names.  Weights are stored in the "x @ W"
# orientation; a loader from torch would transpose nn.Linear weights, and the
# depthwise Conv1d weight (D, 1, Kc) must be stored transposed as (Kc, D).
RAW_LAYER_PARAMS = [
    "ln_ffm_g", "ln_ffm_b", "ffm_w1", "ffm_b1", "ffm_w2", "ffm_b2",
    "ln_mha_g", "ln_mha_b", "wq", "bq", "wk", "bk", "wv", "bv",
    "wpos", "pos_u", "pos_v", "wo", "bo",
    "ln_conv_g", "ln_conv_b", "pw1_w", "pw1_b", "dw_w", "dw_b",
    "bn_g", "bn_b", "bn_mean", "bn_var", "pw2_w", "pw2_b",
    "ln_ff_g", "ln_ff_b", "ff_w1", "ff_b1", "ff_w2", "ff_b2",
    "ln_final_g", "ln_final_b",
]

# Packed / stacked parameter names consumed by the stacked-layer kernel.
_DIRECT_PARAMS = [
    "ln_ffm_g", "ln_ffm_b", "ffm_w1", "ffm_b1", "ffm_w2", "ffm_b2",
    "ln_mha_g", "ln_mha_b", "wo", "bo",
    "ln_conv_g", "ln_conv_b", "pw1_w", "pw1_b", "dw_w", "dw_b",
    "bn_g", "bn_b", "bn_mean", "bn_var", "pw2_w", "pw2_b",
    "ln_ff_g", "ln_ff_b", "ff_w1", "ff_b1", "ff_w2", "ff_b2",
    "ln_final_g", "ln_final_b",
]
LAYER_PARAMS = _DIRECT_PARAMS + ["w_qkv", "b_qkv", "ws_h", "wc_h", "pos_u", "pos_v"]

VMEM_SPEC = pl.BlockSpec(memory_space=pltpu.MemorySpace.VMEM)


# ----------------------------------------------------------------------------- in-kernel math helpers
def _layernorm(x, g, b):
    m = jnp.mean(x, axis=-1, keepdims=True)
    v = jnp.mean((x - m) ** 2, axis=-1, keepdims=True)
    return (x - m) * jax.lax.rsqrt(v + LN_EPS) * g + b


def _sigmoid(x):
    # overflow-safe logistic; reciprocal issues on the EUP slot.
    z = jnp.exp(-jnp.abs(x))
    r = pl.reciprocal(1.0 + z, approx=True)
    return jnp.where(x >= 0, r, z * r)


def _swish(x):
    return x * _sigmoid(x)


def _softmax(x):
    m = jnp.max(x, axis=-1, keepdims=True)
    e = jnp.exp(x - m)
    return e * pl.reciprocal(jnp.sum(e, axis=-1, keepdims=True), approx=True)


def _mm(a, w, b=None):
    """2-D matmul, bf16 operands, f32 accumulate."""
    y = jnp.dot(a.astype(jnp.bfloat16), w.astype(jnp.bfloat16),
                preferred_element_type=jnp.float32)
    return y if b is None else y + b


def _bqk(a, b):
    """(H, M, K) x (H, N, K) -> (H, M, N) batched over heads."""
    return jnp.einsum("hmk,hnk->hmn", a.astype(jnp.bfloat16), b.astype(jnp.bfloat16),
                      preferred_element_type=jnp.float32)


def _bav(a, b):
    """(H, M, N) x (H, N, K) -> (H, M, K) batched over heads."""
    return jnp.einsum("hmn,hnk->hmk", a.astype(jnp.bfloat16), b.astype(jnp.bfloat16),
                      preferred_element_type=jnp.float32)


# ----------------------------------------------------------------------------- stacked conformer-layer kernel
def conformer_stack_kernel(*refs, num_heads):
    """grid = (batch, layer): one OnnxConformerLayer per step, x resident in VMEM."""
    n_fixed = 6
    x_in_ref, mask_ref, ct_ref, st_ref, afg_ref, afb_ref = refs[:n_fixed]
    p_refs = refs[n_fixed:n_fixed + len(LAYER_PARAMS)]
    out_ref = refs[n_fixed + len(LAYER_PARAMS)]
    x_scr, conv_scr = refs[n_fixed + len(LAYER_PARAMS) + 1:]

    pref = dict(zip(LAYER_PARAMS, p_refs))

    def P(name):                       # load one per-layer parameter (drop leading block dim)
        return pref[name][0]

    layer = pl.program_id(1)
    T, D = x_scr.shape
    H = num_heads
    dk = D // H
    Dh = D // 2
    Kc = pref["dw_w"].shape[1]
    pad = (Kc - 1) // 2
    inv_sqrt_dk = 1.0 / math.sqrt(dk)

    @pl.when(layer == 0)
    def _():
        x_scr[...] = x_in_ref[0]

    x = x_scr[...]                     # (T, D) activations for this batch row
    amask = mask_ref[0]                # (1, T) additive key mask (0 / -10000)
    ct = ct_ref[...]                   # (T, Dh)  cos(t * w_m)
    st = st_ref[...]                   # (T, Dh)  sin(t * w_m)

    # ------------------ macaron feed-forward (scale 0.5) ------------------
    xn = _layernorm(x, P("ln_ffm_g"), P("ln_ffm_b"))
    x = x + 0.5 * _mm(_swish(_mm(xn, P("ffm_w1"), P("ffm_b1"))),
                      P("ffm_w2"), P("ffm_b2"))

    # ------------------ rel-pos multi-headed self-attention ------------------
    xn = _layernorm(x, P("ln_mha_g"), P("ln_mha_b"))
    qkv = _mm(xn, P("w_qkv"), P("b_qkv"))          # fused QKV projection -> (T, 3D)
    q = qkv[:, 0:D]
    k = qkv[:, D:2 * D]
    v = qkv[:, 2 * D:3 * D]
    qu = q + P("pos_u")                            # pos biases pre-flattened to (1, D)
    qv = q + P("pos_v")

    def split_heads(m2d):                          # (T, D) -> (H, T, dk)
        return jnp.stack([m2d[:, h * dk:(h + 1) * dk] for h in range(H)], axis=0)

    quh, qvh, kh, vh = split_heads(qu), split_heads(qv), split_heads(k), split_heads(v)

    # Relative-position term (non-legacy rel_shift) without any gather/shift:
    #   bd[h,i,j] = (q+pos_v)_h[i] . (Wpos pe(i-j))_h
    #             = sum_m [ gs*sin((i-j)w_m) + gc*cos((i-j)w_m) ]
    #             = (gs*st_i + gc*ct_i) . ct_j  +  (gc*st_i - gs*ct_i) . st_j
    # with gs/gc = projections of (q+pos_v) onto the even/odd input rows of Wpos.
    gs = _bqk(qvh, P("ws_h"))                      # (H, T, Dh)
    gc = _bqk(qvh, P("wc_h"))                      # (H, T, Dh)
    a_coef = gs * st + gc * ct
    b_coef = gc * st - gs * ct

    # single fused content + positional score matmul per head batch
    lhs = jnp.concatenate([quh, a_coef, b_coef], axis=-1)                 # (H, T, dk+D)
    rhs = jnp.concatenate([kh,
                           jnp.broadcast_to(ct, (H, T, Dh)),
                           jnp.broadcast_to(st, (H, T, Dh))], axis=-1)    # (H, T, dk+D)
    scores = _bqk(lhs, rhs) * inv_sqrt_dk + amask                         # (H, T, T)
    attn = _softmax(scores)
    ctx = _bav(attn, vh)                                                  # (H, T, dk)
    att = jnp.concatenate([ctx[h] for h in range(H)], axis=-1)            # (T, D)
    x = x + _mm(att, P("wo"), P("bo"))

    # ------------------ convolution module ------------------
    xn = _layernorm(x, P("ln_conv_g"), P("ln_conv_b"))
    y2 = _mm(xn, P("pw1_w"), P("pw1_b"))           # pointwise conv 1 -> (T, 2D)
    y = y2[:, 0:D] * _sigmoid(y2[:, D:2 * D])      # GLU over channels

    # depthwise conv1d ('same'): stage the zero-padded signal once in VMEM scratch,
    # then K static-offset ref loads feed the multiply-accumulate taps.
    zpad = jnp.zeros((pad, D), jnp.float32)
    conv_scr[0:pad, :] = zpad
    conv_scr[pad + T:2 * pad + T, :] = zpad
    conv_scr[pad:pad + T, :] = y
    dw = P("dw_w")                                 # (Kc, D)
    acc = jnp.zeros((T, D), jnp.float32)
    for kk in range(Kc):
        acc = acc + conv_scr[kk:kk + T, :] * dw[kk:kk + 1, :]
    acc = acc + P("dw_b")
    yb = (acc - P("bn_mean")) * jax.lax.rsqrt(P("bn_var") + BN_EPS) \
        * P("bn_g") + P("bn_b")                    # BatchNorm1d (eval, running stats)
    x = x + _mm(_swish(yb), P("pw2_w"), P("pw2_b"))

    # ------------------ feed-forward (scale 0.5) ------------------
    xn = _layernorm(x, P("ln_ff_g"), P("ln_ff_b"))
    x = x + 0.5 * _mm(_swish(_mm(xn, P("ff_w1"), P("ff_b1"))),
                      P("ff_w2"), P("ff_b2"))

    # ------------------ per-layer final norm ------------------
    x = _layernorm(x, P("ln_final_g"), P("ln_final_b"))
    x_scr[...] = x

    # encoder after_norm fused into the last layer iteration
    @pl.when(layer == pl.num_programs(1) - 1)
    def _():
        out_ref[0] = _layernorm(x, afg_ref[...], afb_ref[...])


def conformer_stack_pallas(x, att_mask, ct, st, after_g, after_b, stacked, *, num_heads):
    B, T, D = x.shape
    num_layers = stacked["wo"].shape[0]
    Kc = stacked["dw_w"].shape[1]
    pad = (Kc - 1) // 2

    def invariant_spec(a):
        nd = a.ndim
        return pl.BlockSpec(a.shape, lambda b, l, _nd=nd: (0,) * _nd)

    def batch_spec(a):
        nd = a.ndim
        return pl.BlockSpec((1,) + a.shape[1:],
                            lambda b, l, _nd=nd: (b,) + (0,) * (_nd - 1))

    def layer_spec(a):
        nd = a.ndim
        return pl.BlockSpec((1,) + a.shape[1:],
                            lambda b, l, _nd=nd: (l,) + (0,) * (_nd - 1))

    fixed_inputs = [x, att_mask, ct, st, after_g, after_b]
    fixed_specs = [batch_spec(x), batch_spec(att_mask),
                   invariant_spec(ct), invariant_spec(st),
                   invariant_spec(after_g), invariant_spec(after_b)]
    layer_inputs = [stacked[n] for n in LAYER_PARAMS]
    layer_specs = [layer_spec(a) for a in layer_inputs]

    return pl.pallas_call(
        functools.partial(conformer_stack_kernel, num_heads=num_heads),
        out_shape=jax.ShapeDtypeStruct((B, T, D), jnp.float32),
        grid=(B, num_layers),
        in_specs=fixed_specs + layer_specs,
        out_specs=pl.BlockSpec((1, T, D), lambda b, l: (b, 0, 0)),
        scratch_shapes=[pltpu.VMEM((T, D), jnp.float32),
                        pltpu.VMEM((T + 2 * pad, D), jnp.float32)],
        compiler_params=pltpu.CompilerParams(
            dimension_semantics=("parallel", "arbitrary")),
    )(*fixed_inputs, *layer_inputs)


# ----------------------------------------------------------------------------- frontend (Conv2dSubsampling)
def _linear_kernel(x_ref, w_ref, b_ref, o_ref, *, act):
    """o = act(x @ w + b); x:(M,K) w:(K,N) b:(1,N)."""
    y = jnp.dot(x_ref[...].astype(jnp.bfloat16), w_ref[...].astype(jnp.bfloat16),
                preferred_element_type=jnp.float32) + b_ref[...]
    if act == "relu":
        y = jnp.maximum(y, 0.0)
    o_ref[...] = y


def linear_pallas(x2d, w, b, act="none"):
    M = x2d.shape[0]
    N = w.shape[1]
    return pl.pallas_call(
        functools.partial(_linear_kernel, act=act),
        out_shape=jax.ShapeDtypeStruct((M, N), jnp.float32),
        in_specs=[VMEM_SPEC] * 3,
        out_specs=VMEM_SPEC,
    )(x2d, w, b)


def extract_patches(x, k=3, s=2):
    """x: (B, T, F, C) NHWC -> (B, To, Fo, C*k*k), feature order (C, kh, kw)."""
    B, T, F, C = x.shape
    To = (T - k) // s + 1
    Fo = (F - k) // s + 1
    cols = []
    for kh in range(k):
        for kw in range(k):
            cols.append(x[:, kh:kh + s * (To - 1) + 1:s, kw:kw + s * (Fo - 1) + 1:s, :])
    p = jnp.stack(cols, axis=3)                 # (B, To, Fo, k*k, C)
    p = jnp.transpose(p, (0, 1, 2, 4, 3))       # (B, To, Fo, C, k*k)
    return p.reshape(B, To, Fo, C * k * k), To, Fo


def conv2d_subsampling(feats, sp, d_model):
    """Conv2dSubsampling (x4): conv3x3/s2 + ReLU, twice, then Linear."""
    # TODO(synk): fuse both im2col+conv stages and the output Linear into a single
    # Pallas kernel (in-VMEM im2col) to remove the remaining frontend launches.
    B = feats.shape[0]
    x = feats[..., None]                                    # (B, T, F, 1)
    p1, T1, F1 = extract_patches(x, 3, 2)
    y1 = linear_pallas(p1.reshape(B * T1 * F1, -1), sp["conv1_w"], sp["conv1_b"], act="relu")
    y1 = y1.reshape(B, T1, F1, d_model)
    p2, T2, F2 = extract_patches(y1, 3, 2)
    y2 = linear_pallas(p2.reshape(B * T2 * F2, -1), sp["conv2_w"], sp["conv2_b"], act="relu")
    y2 = y2.reshape(B, T2, F2, d_model)
    # torch: x.transpose(1,2).view(b, t, c*f)  (channel-major then freq)
    y2 = jnp.transpose(y2, (0, 1, 3, 2)).reshape(B, T2, d_model * F2)
    out = linear_pallas(y2.reshape(B * T2, d_model * F2), sp["out_w"], sp["out_b"], act="none")
    return out.reshape(B, T2, d_model), T2


# ----------------------------------------------------------------------------- full forward
def conformer_encoder_forward(feats, feats_length, params, *, num_heads=NUM_HEADS):
    B, T_in, _ = feats.shape
    D = D_MODEL

    # MakePadMask(flip=False): 1.0 at valid frames, 0.0 at pad.
    t_idx = jnp.arange(T_in)
    mask0 = (t_idx[None, :] < feats_length[:, None]).astype(jnp.float32)   # (B, T_in)

    # Conv2dSubsampling embed: x and mask[:, :, :-2:2][:, :, :-2:2]
    x, T2 = conv2d_subsampling(feats, params["sub"], D)
    mask_sub = mask0[:, None, :][:, :, :-2:2][:, :, :-2:2]                 # (B, 1, T2)

    # RelPositionalEncoding: x = x * sqrt(D); the pos_emb itself is folded into
    # constant cos/sin angle tables consumed by the stacked-layer kernel.
    x = x * math.sqrt(D)
    inv_freq = jnp.exp(jnp.arange(0, D, 2, dtype=jnp.float32) *
                       (-(math.log(10000.0) / D)))                          # w_m
    ang = jnp.arange(T2, dtype=jnp.float32)[:, None] * inv_freq[None, :]    # (T2, D/2)
    ct, st = jnp.cos(ang), jnp.sin(ang)

    # prepare_mask: additive (0 / -10000) key mask
    att_mask = (1.0 - mask_sub) * -10000.0                                  # (B, 1, T2)

    # all encoder layers + after_norm in one pallas_call
    x = conformer_stack_pallas(x, att_mask, ct, st,
                               params["after_norm_g"], params["after_norm_b"],
                               params["stacked"], num_heads=num_heads)

    # Literal export semantics (quirk of the torch code): olens = mask.squeeze(1).sum(1)
    # on the prepared 4-D additive mask -> a (B, T2) array of 0 / -10000 values,
    # NOT integer lengths.  Kept intentionally to mirror the module.
    mask_add4 = (1.0 - mask_sub[:, None, :, :]) * -10000.0                  # (B, 1, 1, T2)
    olens = jnp.sum(jnp.squeeze(mask_add4, axis=1), axis=1)                 # (B, T2)
    return x, olens


# ----------------------------------------------------------------------------- deterministic init / packing
def _layer_param_shapes(D, H, FF, Kc):
    dk = D // H
    return {
        "ln_ffm_g": (1, D), "ln_ffm_b": (1, D),
        "ffm_w1": (D, FF), "ffm_b1": (1, FF), "ffm_w2": (FF, D), "ffm_b2": (1, D),
        "ln_mha_g": (1, D), "ln_mha_b": (1, D),
        "wq": (D, D), "bq": (1, D), "wk": (D, D), "bk": (1, D), "wv": (D, D), "bv": (1, D),
        "wpos": (D, D), "pos_u": (H, dk), "pos_v": (H, dk), "wo": (D, D), "bo": (1, D),
        "ln_conv_g": (1, D), "ln_conv_b": (1, D),
        "pw1_w": (D, 2 * D), "pw1_b": (1, 2 * D),
        # NOTE: dw_w corresponds to torch depthwise Conv1d weight (D, 1, Kc)
        # stored transposed as (Kc, D) -- a weight loader must transpose.
        "dw_w": (Kc, D), "dw_b": (1, D),
        "bn_g": (1, D), "bn_b": (1, D), "bn_mean": (1, D), "bn_var": (1, D),
        "pw2_w": (D, D), "pw2_b": (1, D),
        "ln_ff_g": (1, D), "ln_ff_b": (1, D),
        "ff_w1": (D, FF), "ff_b1": (1, FF), "ff_w2": (FF, D), "ff_b2": (1, D),
        "ln_final_g": (1, D), "ln_final_b": (1, D),
    }


_ONES = {n for n in RAW_LAYER_PARAMS if n.endswith("_g")} | {"bn_var"}
_ZEROS = ({n for n in RAW_LAYER_PARAMS if n.endswith("_b")} |
          {"bn_mean", "ffm_b1", "ffm_b2", "ff_b1", "ff_b2", "bq", "bk", "bv", "bo"})


def _rand(key, shape, fan_in):
    return jax.random.normal(key, shape, jnp.float32) / math.sqrt(max(fan_in, 1))


def init_params(seed, D, H, FF, Kc, F_in, num_layers):
    key = jax.random.PRNGKey(seed)
    F1 = (F_in - 1) // 2
    F2 = (F1 - 1) // 2
    sub = {
        "conv1_w": _rand(jax.random.fold_in(key, 1), (1 * 9, D), 9),
        "conv1_b": jnp.zeros((1, D), jnp.float32),
        "conv2_w": _rand(jax.random.fold_in(key, 2), (D * 9, D), D * 9),
        "conv2_b": jnp.zeros((1, D), jnp.float32),
        "out_w": _rand(jax.random.fold_in(key, 3), (D * F2, D), D * F2),
        "out_b": jnp.zeros((1, D), jnp.float32),
    }
    shapes = _layer_param_shapes(D, H, FF, Kc)
    layers = []
    for li in range(num_layers):
        lp = {}
        for pi, name in enumerate(RAW_LAYER_PARAMS):
            shp = shapes[name]
            if name in _ONES:
                lp[name] = jnp.ones(shp, jnp.float32)
            elif name in _ZEROS:
                lp[name] = jnp.zeros(shp, jnp.float32)
            else:
                lp[name] = _rand(jax.random.fold_in(key, 100 + li * 100 + pi), shp, shp[0])
        layers.append(lp)
    return {
        "sub": sub,
        "layers": layers,
        "after_norm_g": jnp.ones((1, D), jnp.float32),
        "after_norm_b": jnp.zeros((1, D), jnp.float32),
    }


def pack_params(params, D, H):
    """Stack per-layer params with a leading layer dim; fuse QKV; split Wpos into
    its even(sin)/odd(cos) input rows per head; flatten pos_u/pos_v to (1, D)."""
    dk = D // H
    Dh = D // 2
    layers = params["layers"]

    def stack(fn):
        return jnp.stack([fn(lp) for lp in layers], axis=0)

    stacked = {n: stack(lambda lp, _n=n: lp[_n]) for n in _DIRECT_PARAMS}
    stacked["w_qkv"] = stack(
        lambda lp: jnp.concatenate([lp["wq"], lp["wk"], lp["wv"]], axis=1))
    stacked["b_qkv"] = stack(
        lambda lp: jnp.concatenate([lp["bq"], lp["bk"], lp["bv"]], axis=1))

    def _pos_rows(lp, row0):
        w = lp["wpos"][row0::2, :]                              # (D/2, D)
        return jnp.transpose(w.reshape(Dh, H, dk), (1, 0, 2))   # (H, D/2, dk)

    stacked["ws_h"] = stack(lambda lp: _pos_rows(lp, 0))        # even rows -> sin terms
    stacked["wc_h"] = stack(lambda lp: _pos_rows(lp, 1))        # odd rows  -> cos terms
    stacked["pos_u"] = stack(lambda lp: lp["pos_u"].reshape(1, D))
    stacked["pos_v"] = stack(lambda lp: lp["pos_v"].reshape(1, D))
    return {
        "sub": params["sub"],
        "stacked": stacked,
        "after_norm_g": params["after_norm_g"],
        "after_norm_b": params["after_norm_b"],
    }


# ----------------------------------------------------------------------------- main
if __name__ == "__main__":
    B, T_in, F_in = 2, 50, 20
    key = jax.random.PRNGKey(0)
    feats = jax.random.normal(jax.random.fold_in(key, 999), (B, T_in, F_in), jnp.float32)
    feats_length = jnp.array([50, 35], jnp.int32)

    params = pack_params(
        init_params(0, D_MODEL, NUM_HEADS, D_FF, CNN_KERNEL, F_in, NUM_LAYERS),
        D_MODEL, NUM_HEADS)

    xs_pad, olens = conformer_encoder_forward(feats, feats_length, params)
    xs_pad = jax.block_until_ready(xs_pad)
    olens = jax.block_until_ready(olens)

    T2 = ((T_in - 1) // 2 - 1) // 2  # = 11 for T_in=50
    assert xs_pad.shape == (B, T2, D_MODEL), xs_pad.shape
    assert olens.shape == (B, T2), olens.shape
    assert bool(jnp.all(jnp.isfinite(xs_pad)))
    print("KERNEL_OK")
</pallas_src>

<mosaic_0001>
module attributes {stable_mosaic.version = 11 : i64} {
  func.func @_linear_kernel(%arg0: memref<432x9xf32, #tpu.memory_space<vmem>>, %arg1: memref<9x32xf32, #tpu.memory_space<vmem>>, %arg2: memref<1x32xf32, #tpu.memory_space<vmem>>, %arg3: memref<432x32xf32, #tpu.memory_space<vmem>>) attributes {dimension_semantics = [], scalar_prefetch = 0 : i64, scratch_operands = 0 : i64, tpu.core_type = #tpu.core_type<tc>} {
    %c0 = arith.constant 0 : index
    %c0_0 = arith.constant 0 : index
    %0 = vector.load %arg0[%c0, %c0_0] : memref<432x9xf32, #tpu.memory_space<vmem>>, vector<432x9xf32>
    %1 = arith.truncf %0 : vector<432x9xf32> to vector<432x9xbf16>
    %c0_1 = arith.constant 0 : index
    %c0_2 = arith.constant 0 : index
    %2 = vector.load %arg1[%c0_1, %c0_2] : memref<9x32xf32, #tpu.memory_space<vmem>>, vector<9x32xf32>
    %3 = arith.truncf %2 : vector<9x32xf32> to vector<9x32xbf16>
    %cst = arith.constant dense<0.000000e+00> : vector<432x32xf32>
    %4 = tpu.matmul %1, %3, %cst {dimension_numbers = #tpu.dot_dimension_numbers<[1], [0], [0], [1], [0, 0, 1, 1], [], []>} : vector<432x9xbf16>, vector<9x32xbf16>, vector<432x32xf32> -> vector<432x32xf32>
    %c0_3 = arith.constant 0 : index
    %c0_4 = arith.constant 0 : index
    %5 = vector.load %arg2[%c0_3, %c0_4] : memref<1x32xf32, #tpu.memory_space<vmem>>, vector<1x32xf32>
    %6 = vector.broadcast %5 : vector<1x32xf32> to vector<432x32xf32>
    %7 = arith.addf %4, %6 : vector<432x32xf32>
    %cst_5 = arith.constant 0.000000e+00 : f32
    %8 = vector.broadcast %cst_5 : f32 to vector<432x32xf32>
    %9 = arith.maximumf %7, %8 : vector<432x32xf32>
    %c0_6 = arith.constant 0 : index
    %c0_7 = arith.constant 0 : index
    %10 = vector.load %arg3[%c0_6, %c0_7] : memref<432x32xf32, #tpu.memory_space<vmem>>, vector<432x32xf32>
    tpu.vector_store %arg3[%c0_6, %c0_7], %9 {strides = array<i32>} : memref<432x32xf32, #tpu.memory_space<vmem>>, vector<432x32xf32>,
    return
  }
}

</mosaic_0001>

<bundles_post_ra>
// kernel: tpu_custom_call.1
= control target key start
LH: loop header
LB: loop body
LE: loop exit
PB: predicated region body
PF: predicated region fallthrough
CT: control target
= control target key end

     0   :  { %vm188_vm0 = vcmask 1043456   ;;  %vm189_vm1 = vcmask 1044480   ;;  %v728_v0 = vmov 0.0   ;;  %v729_v3 = vmov 65535   ;;  %s1277_s1 = inlined_call_operand.vmem [shape: f32[9,32], index: 1, kind: input, shape index: {}]   ;;  %s1278_s0 = inlined_call_operand.vmem [shape: f32[432,9], index: 0, kind: input, shape index: {}]   ;;  %s1279_s2 = inlined_call_operand.vmem [shape: f32[1,32], index: 2, kind: input, shape index: {}]   ;;  %s1280_s3 = inlined_call_operand.vmem [shape: f32[432,32], index: 3, kind: output, shape index: {}]  }
   0x1   :  { %613 = vmatprep.subr.bf16.mxu0 %v728_v0  ;;  %v96_v1 = vld [vmem:[%s1277_s1] sm:$0xff]  ;;  %v97_v2 = vld [vmem:[%s1277_s1 + $0x8] sm:$0x1]  ;;  %v190_v4 = vsel %vm188_vm0, 4294967295, %v729_v3  ;;  %723 = vmatprep.subr.bf16.mxu1 %v728_v0  ;;  %vm730_vm2 = vmmov 0   ;;  %vm106_vm3 = vcmask 72704  }
   0x2   :  { %v15_v5 = vld [vmem:[%s1278_s0] sm:$0xff]  ;;  %v98_v6 = vpack.c.bf16 %v97_v2, %v96_v1  ;;  %v191_v7 = vsel %vm189_vm1, %v190_v4, 0  ;;  %615 = vmatprep.mubr.msk.bf16.mxu0 %vm730_vm2, %v728_v0  ;;  %v16_v8 = vld [vmem:[%s1278_s0 + $0x8] sm:$0xff]  ;;  %671 = vmatprep.mubr.msk.bf16.mxu1 %vm730_vm2, %v728_v0  ;;  %v17_v14 = vld [vmem:[%s1278_s0 + $0x10] sm:$0xff]  ;;  %vm498_vm4 = vcmask 261120  }
   0x3   :  { %v43_v9 = vld [vmem:[%s1278_s0 + $0xe0] sm:$0xff]  ;;  %v44_v10 = vld [vmem:[%s1278_s0 + $0xe8] sm:$0xff]  ;;  %v69_v12 = vpack.c.bf16 %v16_v8, %v15_v5  ;;  %v18_v15 = vld [vmem:[%s1278_s0 + $0x18] sm:$0xff] }
   0x4   :  { %v193_v11 = vand.u32 %v191_v7, %v98_v6  ;;  %v83_v13 = vpack.c.bf16 %v44_v10, %v43_v9  ;;  %v45_v16 = vld [vmem:[%s1278_s0 + $0xf0] sm:$0xff]  ;;  %v46_v17 = vld [vmem:[%s1278_s0 + $0xf8] sm:$0xff]  ;;  %v70_v18 = vpack.c.bf16 %v18_v15, %v17_v14  ;;  %v19_v20 = vld [vmem:[%s1278_s0 + $0x20] sm:$0xff] }
   0x5   :  { %v84_v19 = vpack.c.bf16 %v46_v17, %v45_v16  ;;  %v20_v21 = vld [vmem:[%s1278_s0 + $0x28] sm:$0xff]  ;;  %v47_v22 = vld [vmem:[%s1278_s0 + $0x100] sm:$0xff]  ;;  %v21_v26 = vld [vmem:[%s1278_s0 + $0x30] sm:$0xff] }
   0x6   :  { %614 = vmatpush3.bf16.msra.mxu0 %v193_v11  ;;  %724 = vmatpush3.bf16.msra.mxu1 %v193_v11  ;;  %v48_v23 = vld [vmem:[%s1278_s0 + $0x108] sm:$0xff]  ;;  %v71_v24 = vpack.c.bf16 %v20_v21, %v19_v20  ;;  %v22_v27 = vld [vmem:[%s1278_s0 + $0x38] sm:$0xff]  ;;  %v49_v28 = vld [vmem:[%s1278_s0 + $0x110] sm:$0xff] }
   0x7   :  { %v85_v25 = vpack.c.bf16 %v48_v23, %v47_v22  ;;  %v50_v29 = vld [vmem:[%s1278_s0 + $0x118] sm:$0xff]  ;;  %v72_v30 = vpack.c.bf16 %v22_v27, %v21_v26  ;;  %v23_v32 = vld [vmem:[%s1278_s0 + $0x40] sm:$0xff]  ;;  %v24_v33 = vld [vmem:[%s1278_s0 + $0x48] sm:$0xff] }
   0x8   :  { %v86_v31 = vpack.c.bf16 %v50_v29, %v49_v28  ;;  %v51_v34 = vld [vmem:[%s1278_s0 + $0x120] sm:$0xff]  ;;  %v52_v35 = vld [vmem:[%s1278_s0 + $0x128] sm:$0xff]  ;;  %v73_v36 = vpack.c.bf16 %v24_v33, %v23_v32  ;;  %v25_v38 = vld [vmem:[%s1278_s0 + $0x50] sm:$0xff] }
   0x9   :  { %616 = vmatmul.mubr.msk.bf16.vlgmr.msra.gmra.mrb[0].mxu0 %vm106_vm3, %v69_v12  ;;  %672 = vmatmul.mubr.msk.bf16.vlgmr.msra.gmra.mrb[0].mxu1 %vm106_vm3, %v83_v13  ;;  %v87_v37 = vpack.c.bf16 %v52_v35, %v51_v34  ;;  %v26_v39 = vld [vmem:[%s1278_s0 + $0x58] sm:$0xff]  ;;  %v53_v40 = vld [vmem:[%s1278_s0 + $0x130] sm:$0xff]  ;;  %v27_v44 = vld [vmem:[%s1278_s0 + $0x60] sm:$0xff] }
   0xa   :  { %619 = vmatprep.mubr.msk.bf16.mxu0 %vm730_vm2, %v728_v0  ;;  %675 = vmatprep.mubr.msk.bf16.mxu1 %vm730_vm2, %v728_v0  ;;  %v54_v41 = vld [vmem:[%s1278_s0 + $0x138] sm:$0xff]  ;;  %v74_v42 = vpack.c.bf16 %v26_v39, %v25_v38  ;;  %v28_v45 = vld [vmem:[%s1278_s0 + $0x68] sm:$0xff]  ;;  %v55_v46 = vld [vmem:[%s1278_s0 + $0x140] sm:$0xff] }
   0xb   :  { %v88_v43 = vpack.c.bf16 %v54_v41, %v53_v40  ;;  %v56_v47 = vld [vmem:[%s1278_s0 + $0x148] sm:$0xff]  ;;  %v75_v48 = vpack.c.bf16 %v28_v45, %v27_v44  ;;  %v29_v50 = vld [vmem:[%s1278_s0 + $0x70] sm:$0xff]  ;;  %v30_v51 = vld [vmem:[%s1278_s0 + $0x78] sm:$0xff] }
   0xc   :  { %v89_v49 = vpack.c.bf16 %v56_v47, %v55_v46  ;;  %v57_v52 = vld [vmem:[%s1278_s0 + $0x150] sm:$0xff]  ;;  %v58_v53 = vld [vmem:[%s1278_s0 + $0x158] sm:$0xff]  ;;  %v76_v54 = vpack.c.bf16 %v30_v51, %v29_v50  ;;  %v31_v56 = vld [vmem:[%s1278_s0 + $0x80] sm:$0xff] }
   0xd   :  { %v90_v55 = vpack.c.bf16 %v58_v53, %v57_v52  ;;  %v32_v57 = vld [vmem:[%s1278_s0 + $0x88] sm:$0xff]  ;;  %v59_v58 = vld [vmem:[%s1278_s0 + $0x160] sm:$0xff]  ;;  %v33_v62 = vld [vmem:[%s1278_s0 + $0x90] sm:$0xff] }
   0xe   :  { %v60_v59 = vld [vmem:[%s1278_s0 + $0x168] sm:$0xff]  ;;  %v77_v60 = vpack.c.bf16 %v32_v57, %v31_v56  ;;  %v34_v63 = vld [vmem:[%s1278_s0 + $0x98] sm:$0xff]  ;;  %v61_v1 = vld [vmem:[%s1278_s0 + $0x170] sm:$0xff] }
   0xf   :  { %v91_v61 = vpack.c.bf16 %v60_v59, %v59_v58  ;;  %v62_v2 = vld [vmem:[%s1278_s0 + $0x178] sm:$0xff]  ;;  %v78_v3 = vpack.c.bf16 %v34_v63, %v33_v62  ;;  %v35_v5 = vld [vmem:[%s1278_s0 + $0xa0] sm:$0xff]  ;;  %v36_v6 = vld [vmem:[%s1278_s0 + $0xa8] sm:$0xff] }
  0x10   :  { %v92_v4 = vpack.c.bf16 %v62_v2, %v61_v1  ;;  %v63_v7 = vld [vmem:[%s1278_s0 + $0x180] sm:$0xff]  ;;  %v64_v8 = vld [vmem:[%s1278_s0 + $0x188] sm:$0xff]  ;;  %v79_v9 = vpack.c.bf16 %v36_v6, %v35_v5  ;;  %v37_v11 = vld [vmem:[%s1278_s0 + $0xb0] sm:$0xff] }
  0x11   :  { %620 = vmatmul.mubr.msk.bf16.gmra.mrb[4].mxu0 %vm106_vm3, %v70_v18  ;;  %676 = vmatmul.mubr.msk.bf16.gmra.mrb[4].mxu1 %vm106_vm3, %v84_v19  ;;  %v93_v10 = vpack.c.bf16 %v64_v8, %v63_v7  ;;  %v38_v12 = vld [vmem:[%s1278_s0 + $0xb8] sm:$0xff]  ;;  %v65_v13 = vld [vmem:[%s1278_s0 + $0x190] sm:$0xff]  ;;  %v39_v17 = vld [vmem:[%s1278_s0 + $0xc0] sm:$0xff] }
  0x12   :  { %623 = vmatprep.mubr.msk.bf16.mxu0 %vm730_vm2, %v728_v0  ;;  %679 = vmatprep.mubr.msk.bf16.mxu1 %vm730_vm2, %v728_v0  ;;  %v66_v14 = vld [vmem:[%s1278_s0 + $0x198] sm:$0xff]  ;;  %v80_v15 = vpack.c.bf16 %v38_v12, %v37_v11  ;;  %v40_v18 = vld [vmem:[%s1278_s0 + $0xc8] sm:$0xff]  ;;  %v67_v19 = vld [vmem:[%s1278_s0 + $0x1a0] sm:$0xff] }
  0x13   :  { %v94_v16 = vpack.c.bf16 %v66_v14, %v65_v13  ;;  %v68_v20 = vld [vmem:[%s1278_s0 + $0x1a8] sm:$0xff]  ;;  %v81_v21 = vpack.c.bf16 %v40_v18, %v39_v17  ;;  %v41_v23 = vld [vmem:[%s1278_s0 + $0xd0] sm:$0xff]  ;;  %v1005_v26 = vld [vmem:[%s1279_s2] ss:$0 sm:$0xff] }
  0x14   :  { %v95_v22 = vpack.c.bf16 %v68_v20, %v67_v19 }
  0x19   :  { %624 = vmatmul.mubr.msk.bf16.gmra.mrb[8].mxu0 %vm106_vm3, %v71_v24  ;;  %680 = vmatmul.mubr.msk.bf16.gmra.mrb[8].mxu1 %vm106_vm3, %v85_v25  ;;  %v42_v24 = vld [vmem:[%s1278_s0 + $0xd8] sm:$0xff] }
  0x1a   :  { %627 = vmatprep.mubr.msk.bf16.mxu0 %vm730_vm2, %v728_v0  ;;  %683 = vmatprep.mubr.msk.bf16.mxu1 %vm730_vm2, %v728_v0  ;;  %v82_v25 = vpack.c.bf16 %v42_v24, %v41_v23 }
  0x21   :  { %628 = vmatmul.mubr.msk.bf16.gmra.mrb[12].mxu0 %vm106_vm3, %v72_v30  ;;  %684 = vmatmul.mubr.msk.bf16.gmra.mrb[12].mxu1 %vm106_vm3, %v86_v31 }
  0x22   :  { %631 = vmatprep.mubr.msk.bf16.mxu0 %vm730_vm2, %v728_v0  ;;  %687 = vmatprep.mubr.msk.bf16.mxu1 %vm730_vm2, %v728_v0 }
  0x29   :  { %632 = vmatmul.mubr.msk.bf16.gmra.mrb[16].mxu0 %vm106_vm3, %v73_v36  ;;  %688 = vmatmul.mubr.msk.bf16.gmra.mrb[16].mxu1 %vm106_vm3, %v87_v37 }
  0x2a   :  { %635 = vmatprep.mubr.msk.bf16.mxu0 %vm730_vm2, %v728_v0  ;;  %691 = vmatprep.mubr.msk.bf16.mxu1 %vm730_vm2, %v728_v0 }
  0x31   :  { %636 = vmatmul.mubr.msk.bf16.gmra.mrb[20].mxu0 %vm106_vm3, %v74_v42  ;;  %692 = vmatmul.mubr.msk.bf16.gmra.mrb[20].mxu1 %vm106_vm3, %v88_v43 }
  0x32   :  { %639 = vmatprep.mubr.msk.bf16.mxu0 %vm730_vm2, %v728_v0  ;;  %695 = vmatprep.mubr.msk.bf16.mxu1 %vm730_vm2, %v728_v0 }
  0x39   :  { %640 = vmatmul.mubr.msk.bf16.gmra.mrb[24].mxu0 %vm106_vm3, %v75_v48  ;;  %696 = vmatmul.mubr.msk.bf16.gmra.mrb[24].mxu1 %vm106_vm3, %v89_v49 }
  0x3a   :  { %643 = vmatprep.mubr.msk.bf16.mxu0 %vm730_vm2, %v728_v0  ;;  %699 = vmatprep.mubr.msk.bf16.mxu1 %vm730_vm2, %v728_v0 }
  0x41   :  { %644 = vmatmul.mubr.msk.bf16.gmra.mrb[28].mxu0 %vm106_vm3, %v76_v54  ;;  %700 = vmatmul.mubr.msk.bf16.gmra.mrb[28].mxu1 %vm106_vm3, %v90_v55 }
  0x42   :  { %647 = vmatprep.mubr.msk.bf16.mxu0 %vm730_vm2, %v728_v0  ;;  %703 = vmatprep.mubr.msk.bf16.mxu1 %vm730_vm2, %v728_v0 }
  0x49   :  { %648 = vmatmul.mubr.msk.bf16.gmra.mrb[32].mxu0 %vm106_vm3, %v77_v60  ;;  %704 = vmatmul.mubr.msk.bf16.gmra.mrb[32].mxu1 %vm106_vm3, %v91_v61 }
  0x4a   :  { %651 = vmatprep.mubr.msk.bf16.mxu0 %vm730_vm2, %v728_v0  ;;  %707 = vmatprep.mubr.msk.bf16.mxu1 %vm730_vm2, %v728_v0 }
  0x51   :  { %652 = vmatmul.mubr.msk.bf16.gmra.mrb[36].mxu0 %vm106_vm3, %v78_v3  ;;  %708 = vmatmul.mubr.msk.bf16.gmra.mrb[36].mxu1 %vm106_vm3, %v92_v4 }
  0x52   :  { %655 = vmatprep.mubr.msk.bf16.mxu0 %vm730_vm2, %v728_v0  ;;  %711 = vmatprep.mubr.msk.bf16.mxu1 %vm730_vm2, %v728_v0 }
  0x59   :  { %656 = vmatmul.mubr.msk.bf16.gmra.mrb[40].mxu0 %vm106_vm3, %v79_v9  ;;  %712 = vmatmul.mubr.msk.bf16.gmra.mrb[40].mxu1 %vm106_vm3, %v93_v10 }
  0x5a   :  { %659 = vmatprep.mubr.msk.bf16.mxu0 %vm730_vm2, %v728_v0  ;;  %715 = vmatprep.mubr.msk.bf16.mxu1 %vm730_vm2, %v728_v0 }
  0x61   :  { %660 = vmatmul.mubr.msk.bf16.gmra.mrb[44].mxu0 %vm106_vm3, %v80_v15  ;;  %716 = vmatmul.mubr.msk.bf16.gmra.mrb[44].mxu1 %vm106_vm3, %v94_v16 }
  0x62   :  { %663 = vmatprep.mubr.msk.bf16.mxu0 %vm730_vm2, %v728_v0  ;;  %719 = vmatprep.mubr.msk.bf16.mxu1 %vm730_vm2, %v728_v0 }
  0x69   :  { %664 = vmatmul.mubr.msk.bf16.gmra.mrb[48].mxu0 %vm106_vm3, %v81_v21  ;;  %720 = vmatmul.mubr.msk.bf16.gmra.mrb[48].mxu1 %vm106_vm3, %v95_v22 }
  0x6a   :  { %667 = vmatprep.mubr.msk.bf16.mxu0 %vm730_vm2, %v728_v0 }
  0x71   :  { %668 = vmatmul.mubr.msk.bf16.gmra.mrb[52].mxu0 %vm106_vm3, %v82_v25 }
  0xdc   :  { %v229_v27 = vpop.f32.mrb[0].mxu0  ;;  %v341_v28 = vpop.f32.mrb[0].mxu1 }
  0xdd   :  { %v230_v0 = vadd.f32 %v1005_v26, %v229_v27  ;;  %v617_v29 = vpop.f32.mrb[1].mxu0  ;;  %v342_v30 = vadd.f32 %v1005_v26, %v341_v28  ;;  %v673_v31 = vpop.f32.mrb[1].mxu1 }
  0xde   :  { %v232_v32 = vpop.f32.mrb[2].mxu0  ;;  %v344_v33 = vpop.f32.mrb[2].mxu1 }
  0xdf   :  { %v444_v34 = vmax.f32 %v230_v0, 0.0  ;;  %v233_v35 = vadd.f32 %v1005_v26, %v232_v32  ;;  %v618_v36 = vpop.f32.mrb[3].mxu0  ;;  %v472_v37 = vmax.f32 %v342_v30, 0.0  ;;  %v345_v38 = vadd.f32 %v1005_v26, %v344_v33  ;;  %v674_v39 = vpop.f32.mrb[3].mxu1 }
  0xe1   :  { %499 = vst.msk [vmem:[%s1280_s3] sm:$0xff] %vm498_vm4, %v444_v34  ;;  %v445_v40 = vmax.f32 %v233_v35, 0.0  ;;  %527 = vst.msk [vmem:[%s1280_s3 + $0xe0] sm:$0xff] %vm498_vm4, %v472_v37  ;;  %v473_v41 = vmax.f32 %v345_v38, 0.0 }
  0xe3   :  { %500 = vst.msk [vmem:[%s1280_s3 + $0x8] sm:$0xff] %vm498_vm4, %v445_v40  ;;  %528 = vst.msk [vmem:[%s1280_s3 + $0xe8] sm:$0xff] %vm498_vm4, %v473_v41 }
  0xe4   :  { %v237_v42 = vpop.f32.mrb[4].mxu0  ;;  %v349_v43 = vpop.f32.mrb[4].mxu1 }
  0xe5   :  { %v238_v44 = vadd.f32 %v1005_v26, %v237_v42  ;;  %v621_v45 = vpop.f32.mrb[5].mxu0  ;;  %v350_v46 = vadd.f32 %v1005_v26, %v349_v43  ;;  %v677_v47 = vpop.f32.mrb[5].mxu1 }
  0xe6   :  { %v240_v48 = vpop.f32.mrb[6].mxu0  ;;  %v352_v49 = vpop.f32.mrb[6].mxu1 }
  0xe7   :  { %v446_v50 = vmax.f32 %v238_v44, 0.0  ;;  %v241_v51 = vadd.f32 %v1005_v26, %v240_v48  ;;  %v622_v52 = vpop.f32.mrb[7].mxu0  ;;  %v474_v53 = vmax.f32 %v350_v46, 0.0  ;;  %v353_v54 = vadd.f32 %v1005_v26, %v352_v49  ;;  %v678_v55 = vpop.f32.mrb[7].mxu1 }
  0xe9   :  { %501 = vst.msk [vmem:[%s1280_s3 + $0x10] sm:$0xff] %vm498_vm4, %v446_v50  ;;  %v447_v56 = vmax.f32 %v241_v51, 0.0  ;;  %529 = vst.msk [vmem:[%s1280_s3 + $0xf0] sm:$0xff] %vm498_vm4, %v474_v53  ;;  %v475_v57 = vmax.f32 %v353_v54, 0.0 }
  0xeb   :  { %502 = vst.msk [vmem:[%s1280_s3 + $0x18] sm:$0xff] %vm498_vm4, %v447_v56  ;;  %530 = vst.msk [vmem:[%s1280_s3 + $0xf8] sm:$0xff] %vm498_vm4, %v475_v57 }
  0xec   :  { %v245_v58 = vpop.f32.mrb[8].mxu0  ;;  %v357_v59 = vpop.f32.mrb[8].mxu1 }
  0xed   :  { %v246_v60 = vadd.f32 %v1005_v26, %v245_v58  ;;  %v625_v61 = vpop.f32.mrb[9].mxu0  ;;  %v358_v62 = vadd.f32 %v1005_v26, %v357_v59  ;;  %v681_v63 = vpop.f32.mrb[9].mxu1 }
  0xee   :  { %v248_v1 = vpop.f32.mrb[10].mxu0  ;;  %v360_v2 = vpop.f32.mrb[10].mxu1 }
  0xef   :  { %v448_v3 = vmax.f32 %v246_v60, 0.0  ;;  %v249_v4 = vadd.f32 %v1005_v26, %v248_v1  ;;  %v626_v5 = vpop.f32.mrb[11].mxu0  ;;  %v476_v6 = vmax.f32 %v358_v62, 0.0  ;;  %v361_v7 = vadd.f32 %v1005_v26, %v360_v2  ;;  %v682_v8 = vpop.f32.mrb[11].mxu1 }
  0xf1   :  { %503 = vst.msk [vmem:[%s1280_s3 + $0x20] sm:$0xff] %vm498_vm4, %v448_v3  ;;  %v449_v9 = vmax.f32 %v249_v4, 0.0  ;;  %531 = vst.msk [vmem:[%s1280_s3 + $0x100] sm:$0xff] %vm498_vm4, %v476_v6  ;;  %v477_v10 = vmax.f32 %v361_v7, 0.0 }
  0xf3   :  { %504 = vst.msk [vmem:[%s1280_s3 + $0x28] sm:$0xff] %vm498_vm4, %v449_v9  ;;  %532 = vst.msk [vmem:[%s1280_s3 + $0x108] sm:$0xff] %vm498_vm4, %v477_v10 }
  0xf4   :  { %v253_v11 = vpop.f32.mrb[12].mxu0  ;;  %v365_v12 = vpop.f32.mrb[12].mxu1 }
  0xf5   :  { %v254_v13 = vadd.f32 %v1005_v26, %v253_v11  ;;  %v629_v14 = vpop.f32.mrb[13].mxu0  ;;  %v366_v15 = vadd.f32 %v1005_v26, %v365_v12  ;;  %v685_v16 = vpop.f32.mrb[13].mxu1 }
  0xf6   :  { %v256_v17 = vpop.f32.mrb[14].mxu0  ;;  %v368_v18 = vpop.f32.mrb[14].mxu1 }
  0xf7   :  { %v450_v19 = vmax.f32 %v254_v13, 0.0  ;;  %v257_v20 = vadd.f32 %v1005_v26, %v256_v17  ;;  %v630_v21 = vpop.f32.mrb[15].mxu0  ;;  %v478_v22 = vmax.f32 %v366_v15, 0.0  ;;  %v369_v23 = vadd.f32 %v1005_v26, %v368_v18  ;;  %v686_v24 = vpop.f32.mrb[15].mxu1 }
  0xf9   :  { %505 = vst.msk [vmem:[%s1280_s3 + $0x30] sm:$0xff] %vm498_vm4, %v450_v19  ;;  %v451_v25 = vmax.f32 %v257_v20, 0.0  ;;  %533 = vst.msk [vmem:[%s1280_s3 + $0x110] sm:$0xff] %vm498_vm4, %v478_v22  ;;  %v479_v27 = vmax.f32 %v369_v23, 0.0 }
  0xfb   :  { %506 = vst.msk [vmem:[%s1280_s3 + $0x38] sm:$0xff] %vm498_vm4, %v451_v25  ;;  %534 = vst.msk [vmem:[%s1280_s3 + $0x118] sm:$0xff] %vm498_vm4, %v479_v27 }
  0xfc   :  { %v261_v28 = vpop.f32.mrb[16].mxu0  ;;  %v373_v0 = vpop.f32.mrb[16].mxu1 }
  0xfd   :  { %v262_v29 = vadd.f32 %v1005_v26, %v261_v28  ;;  %v633_v30 = vpop.f32.mrb[17].mxu0  ;;  %v374_v31 = vadd.f32 %v1005_v26, %v373_v0  ;;  %v689_v32 = vpop.f32.mrb[17].mxu1 }
  0xfe   :  { %v264_v33 = vpop.f32.mrb[18].mxu0  ;;  %v376_v34 = vpop.f32.mrb[18].mxu1 }
  0xff   :  { %v452_v35 = vmax.f32 %v262_v29, 0.0  ;;  %v265_v36 = vadd.f32 %v1005_v26, %v264_v33  ;;  %v634_v37 = vpop.f32.mrb[19].mxu0  ;;  %v480_v38 = vmax.f32 %v374_v31, 0.0  ;;  %v377_v39 = vadd.f32 %v1005_v26, %v376_v34  ;;  %v690_v40 = vpop.f32.mrb[19].mxu1 }
 0x101   :  { %507 = vst.msk [vmem:[%s1280_s3 + $0x40] sm:$0xff] %vm498_vm4, %v452_v35  ;;  %v453_v41 = vmax.f32 %v265_v36, 0.0  ;;  %535 = vst.msk [vmem:[%s1280_s3 + $0x120] sm:$0xff] %vm498_vm4, %v480_v38  ;;  %v481_v42 = vmax.f32 %v377_v39, 0.0 }
 0x103   :  { %508 = vst.msk [vmem:[%s1280_s3 + $0x48] sm:$0xff] %vm498_vm4, %v453_v41  ;;  %536 = vst.msk [vmem:[%s1280_s3 + $0x128] sm:$0xff] %vm498_vm4, %v481_v42 }
 0x104   :  { %v269_v43 = vpop.f32.mrb[20].mxu0  ;;  %v381_v44 = vpop.f32.mrb[20].mxu1 }
 0x105   :  { %v270_v45 = vadd.f32 %v1005_v26, %v269_v43  ;;  %v637_v46 = vpop.f32.mrb[21].mxu0  ;;  %v382_v47 = vadd.f32 %v1005_v26, %v381_v44  ;;  %v693_v48 = vpop.f32.mrb[21].mxu1 }
 0x106   :  { %v272_v49 = vpop.f32.mrb[22].mxu0  ;;  %v384_v50 = vpop.f32.mrb[22].mxu1 }
 0x107   :  { %v454_v51 = vmax.f32 %v270_v45, 0.0  ;;  %v273_v52 = vadd.f32 %v1005_v26, %v272_v49  ;;  %v638_v53 = vpop.f32.mrb[23].mxu0  ;;  %v482_v54 = vmax.f32 %v382_v47, 0.0  ;;  %v385_v55 = vadd.f32 %v1005_v26, %v384_v50  ;;  %v694_v56 = vpop.f32.mrb[23].mxu1 }
 0x109   :  { %509 = vst.msk [vmem:[%s1280_s3 + $0x50] sm:$0xff] %vm498_vm4, %v454_v51  ;;  %v455_v57 = vmax.f32 %v273_v52, 0.0  ;;  %537 = vst.msk [vmem:[%s1280_s3 + $0x130] sm:$0xff] %vm498_vm4, %v482_v54  ;;  %v483_v58 = vmax.f32 %v385_v55, 0.0 }
 0x10b   :  { %510 = vst.msk [vmem:[%s1280_s3 + $0x58] sm:$0xff] %vm498_vm4, %v455_v57  ;;  %538 = vst.msk [vmem:[%s1280_s3 + $0x138] sm:$0xff] %vm498_vm4, %v483_v58 }
 0x10c   :  { %v277_v59 = vpop.f32.mrb[24].mxu0  ;;  %v389_v60 = vpop.f32.mrb[24].mxu1 }
 0x10d   :  { %v278_v61 = vadd.f32 %v1005_v26, %v277_v59  ;;  %v641_v62 = vpop.f32.mrb[25].mxu0  ;;  %v390_v63 = vadd.f32 %v1005_v26, %v389_v60  ;;  %v697_v1 = vpop.f32.mrb[25].mxu1 }
 0x10e   :  { %v280_v2 = vpop.f32.mrb[26].mxu0  ;;  %v392_v3 = vpop.f32.mrb[26].mxu1 }
 0x10f   :  { %v456_v4 = vmax.f32 %v278_v61, 0.0  ;;  %v281_v5 = vadd.f32 %v1005_v26, %v280_v2  ;;  %v642_v6 = vpop.f32.mrb[27].mxu0  ;;  %v484_v7 = vmax.f32 %v390_v63, 0.0  ;;  %v393_v8 = vadd.f32 %v1005_v26, %v392_v3  ;;  %v698_v9 = vpop.f32.mrb[27].mxu1 }
 0x111   :  { %511 = vst.msk [vmem:[%s1280_s3 + $0x60] sm:$0xff] %vm498_vm4, %v456_v4  ;;  %v457_v10 = vmax.f32 %v281_v5, 0.0  ;;  %539 = vst.msk [vmem:[%s1280_s3 + $0x140] sm:$0xff] %vm498_vm4, %v484_v7  ;;  %v485_v11 = vmax.f32 %v393_v8, 0.0 }
 0x113   :  { %512 = vst.msk [vmem:[%s1280_s3 + $0x68] sm:$0xff] %vm498_vm4, %v457_v10  ;;  %540 = vst.msk [vmem:[%s1280_s3 + $0x148] sm:$0xff] %vm498_vm4, %v485_v11 }
 0x114   :  { %v285_v12 = vpop.f32.mrb[28].mxu0  ;;  %v397_v13 = vpop.f32.mrb[28].mxu1 }
 0x115   :  { %v286_v14 = vadd.f32 %v1005_v26, %v285_v12  ;;  %v645_v15 = vpop.f32.mrb[29].mxu0  ;;  %v398_v16 = vadd.f32 %v1005_v26, %v397_v13  ;;  %v701_v17 = vpop.f32.mrb[29].mxu1 }
 0x116   :  { %v288_v18 = vpop.f32.mrb[30].mxu0  ;;  %v400_v19 = vpop.f32.mrb[30].mxu1 }
 0x117   :  { %v458_v20 = vmax.f32 %v286_v14, 0.0  ;;  %v289_v21 = vadd.f32 %v1005_v26, %v288_v18  ;;  %v646_v22 = vpop.f32.mrb[31].mxu0  ;;  %v486_v23 = vmax.f32 %v398_v16, 0.0  ;;  %v401_v24 = vadd.f32 %v1005_v26, %v400_v19  ;;  %v702_v25 = vpop.f32.mrb[31].mxu1 }
 0x119   :  { %513 = vst.msk [vmem:[%s1280_s3 + $0x70] sm:$0xff] %vm498_vm4, %v458_v20  ;;  %v459_v27 = vmax.f32 %v289_v21, 0.0  ;;  %541 = vst.msk [vmem:[%s1280_s3 + $0x150] sm:$0xff] %vm498_vm4, %v486_v23  ;;  %v487_v28 = vmax.f32 %v401_v24, 0.0 }
 0x11b   :  { %514 = vst.msk [vmem:[%s1280_s3 + $0x78] sm:$0xff] %vm498_vm4, %v459_v27  ;;  %542 = vst.msk [vmem:[%s1280_s3 + $0x158] sm:$0xff] %vm498_vm4, %v487_v28 }
 0x11c   :  { %v293_v0 = vpop.f32.mrb[32].mxu0  ;;  %v405_v29 = vpop.f32.mrb[32].mxu1 }
 0x11d   :  { %v294_v30 = vadd.f32 %v1005_v26, %v293_v0  ;;  %v649_v31 = vpop.f32.mrb[33].mxu0  ;;  %v406_v32 = vadd.f32 %v1005_v26, %v405_v29  ;;  %v705_v33 = vpop.f32.mrb[33].mxu1 }
 0x11e   :  { %v296_v34 = vpop.f32.mrb[34].mxu0  ;;  %v408_v35 = vpop.f32.mrb[34].mxu1 }
 0x11f   :  { %v460_v36 = vmax.f32 %v294_v30, 0.0  ;;  %v297_v37 = vadd.f32 %v1005_v26, %v296_v34  ;;  %v650_v38 = vpop.f32.mrb[35].mxu0  ;;  %v488_v39 = vmax.f32 %v406_v32, 0.0  ;;  %v409_v40 = vadd.f32 %v1005_v26, %v408_v35  ;;  %v706_v41 = vpop.f32.mrb[35].mxu1 }
 0x121   :  { %515 = vst.msk [vmem:[%s1280_s3 + $0x80] sm:$0xff] %vm498_vm4, %v460_v36  ;;  %v461_v42 = vmax.f32 %v297_v37, 0.0  ;;  %543 = vst.msk [vmem:[%s1280_s3 + $0x160] sm:$0xff] %vm498_vm4, %v488_v39  ;;  %v489_v43 = vmax.f32 %v409_v40, 0.0 }
 0x123   :  { %516 = vst.msk [vmem:[%s1280_s3 + $0x88] sm:$0xff] %vm498_vm4, %v461_v42  ;;  %544 = vst.msk [vmem:[%s1280_s3 + $0x168] sm:$0xff] %vm498_vm4, %v489_v43 }
 0x124   :  { %v301_v44 = vpop.f32.mrb[36].mxu0  ;;  %v413_v45 = vpop.f32.mrb[36].mxu1 }
 0x125   :  { %v302_v46 = vadd.f32 %v1005_v26, %v301_v44  ;;  %v653_v47 = vpop.f32.mrb[37].mxu0  ;;  %v414_v48 = vadd.f32 %v1005_v26, %v413_v45  ;;  %v709_v49 = vpop.f32.mrb[37].mxu1 }
 0x126   :  { %v304_v50 = vpop.f32.mrb[38].mxu0  ;;  %v416_v51 = vpop.f32.mrb[38].mxu1 }
 0x127   :  { %v462_v52 = vmax.f32 %v302_v46, 0.0  ;;  %v305_v53 = vadd.f32 %v1005_v26, %v304_v50  ;;  %v654_v54 = vpop.f32.mrb[39].mxu0  ;;  %v490_v55 = vmax.f32 %v414_v48, 0.0  ;;  %v417_v56 = vadd.f32 %v1005_v26, %v416_v51  ;;  %v710_v57 = vpop.f32.mrb[39].mxu1 }
 0x129   :  { %517 = vst.msk [vmem:[%s1280_s3 + $0x90] sm:$0xff] %vm498_vm4, %v462_v52  ;;  %v463_v58 = vmax.f32 %v305_v53, 0.0  ;;  %545 = vst.msk [vmem:[%s1280_s3 + $0x170] sm:$0xff] %vm498_vm4, %v490_v55  ;;  %v491_v59 = vmax.f32 %v417_v56, 0.0 }
 0x12b   :  { %518 = vst.msk [vmem:[%s1280_s3 + $0x98] sm:$0xff] %vm498_vm4, %v463_v58  ;;  %546 = vst.msk [vmem:[%s1280_s3 + $0x178] sm:$0xff] %vm498_vm4, %v491_v59 }
 0x12c   :  { %v309_v60 = vpop.f32.mrb[40].mxu0  ;;  %v421_v61 = vpop.f32.mrb[40].mxu1 }
 0x12d   :  { %v310_v62 = vadd.f32 %v1005_v26, %v309_v60  ;;  %v657_v63 = vpop.f32.mrb[41].mxu0  ;;  %v422_v1 = vadd.f32 %v1005_v26, %v421_v61  ;;  %v713_v2 = vpop.f32.mrb[41].mxu1 }
 0x12e   :  { %v312_v3 = vpop.f32.mrb[42].mxu0  ;;  %v424_v4 = vpop.f32.mrb[42].mxu1 }
 0x12f   :  { %v464_v5 = vmax.f32 %v310_v62, 0.0  ;;  %v313_v6 = vadd.f32 %v1005_v26, %v312_v3  ;;  %v658_v7 = vpop.f32.mrb[43].mxu0  ;;  %v492_v8 = vmax.f32 %v422_v1, 0.0  ;;  %v425_v9 = vadd.f32 %v1005_v26, %v424_v4  ;;  %v714_v10 = vpop.f32.mrb[43].mxu1 }
 0x131   :  { %519 = vst.msk [vmem:[%s1280_s3 + $0xa0] sm:$0xff] %vm498_vm4, %v464_v5  ;;  %v465_v11 = vmax.f32 %v313_v6, 0.0  ;;  %547 = vst.msk [vmem:[%s1280_s3 + $0x180] sm:$0xff] %vm498_vm4, %v492_v8  ;;  %v493_v12 = vmax.f32 %v425_v9, 0.0 }
 0x133   :  { %520 = vst.msk [vmem:[%s1280_s3 + $0xa8] sm:$0xff] %vm498_vm4, %v465_v11  ;;  %548 = vst.msk [vmem:[%s1280_s3 + $0x188] sm:$0xff] %vm498_vm4, %v493_v12 }
 0x134   :  { %v317_v13 = vpop.f32.mrb[44].mxu0  ;;  %v429_v14 = vpop.f32.mrb[44].mxu1 }
 0x135   :  { %v318_v15 = vadd.f32 %v1005_v26, %v317_v13  ;;  %v661_v16 = vpop.f32.mrb[45].mxu0  ;;  %v430_v17 = vadd.f32 %v1005_v26, %v429_v14  ;;  %v717_v18 = vpop.f32.mrb[45].mxu1 }
 0x136   :  { %v320_v19 = vpop.f32.mrb[46].mxu0  ;;  %v432_v20 = vpop.f32.mrb[46].mxu1 }
 0x137   :  { %v466_v21 = vmax.f32 %v318_v15, 0.0  ;;  %v321_v22 = vadd.f32 %v1005_v26, %v320_v19  ;;  %v662_v23 = vpop.f32.mrb[47].mxu0  ;;  %v494_v24 = vmax.f32 %v430_v17, 0.0  ;;  %v433_v25 = vadd.f32 %v1005_v26, %v432_v20  ;;  %v718_v27 = vpop.f32.mrb[47].mxu1 }
 0x139   :  { %521 = vst.msk [vmem:[%s1280_s3 + $0xb0] sm:$0xff] %vm498_vm4, %v466_v21  ;;  %v467_v28 = vmax.f32 %v321_v22, 0.0  ;;  %549 = vst.msk [vmem:[%s1280_s3 + $0x190] sm:$0xff] %vm498_vm4, %v494_v24  ;;  %v495_v0 = vmax.f32 %v433_v25, 0.0 }
 0x13b   :  { %522 = vst.msk [vmem:[%s1280_s3 + $0xb8] sm:$0xff] %vm498_vm4, %v467_v28  ;;  %550 = vst.msk [vmem:[%s1280_s3 + $0x198] sm:$0xff] %vm498_vm4, %v495_v0 }
 0x13c   :  { %v325_v29 = vpop.f32.mrb[48].mxu0  ;;  %v437_v30 = vpop.f32.mrb[48].mxu1 }
 0x13d   :  { %v326_v31 = vadd.f32 %v1005_v26, %v325_v29  ;;  %v665_v32 = vpop.f32.mrb[49].mxu0  ;;  %v438_v33 = vadd.f32 %v1005_v26, %v437_v30  ;;  %v721_v34 = vpop.f32.mrb[49].mxu1 }
 0x13e   :  { %v328_v35 = vpop.f32.mrb[50].mxu0  ;;  %v440_v36 = vpop.f32.mrb[50].mxu1 }
 0x13f   :  { %v468_v37 = vmax.f32 %v326_v31, 0.0  ;;  %v329_v38 = vadd.f32 %v1005_v26, %v328_v35  ;;  %v666_v39 = vpop.f32.mrb[51].mxu0  ;;  %v496_v40 = vmax.f32 %v438_v33, 0.0  ;;  %v441_v41 = vadd.f32 %v1005_v26, %v440_v36  ;;  %v722_v42 = vpop.f32.mrb[51].mxu1 }
 0x141   :  { %523 = vst.msk [vmem:[%s1280_s3 + $0xc0] sm:$0xff] %vm498_vm4, %v468_v37  ;;  %v469_v43 = vmax.f32 %v329_v38, 0.0  ;;  %551 = vst.msk [vmem:[%s1280_s3 + $0x1a0] sm:$0xff] %vm498_vm4, %v496_v40  ;;  %v497_v44 = vmax.f32 %v441_v41, 0.0 }
 0x143   :  { %524 = vst.msk [vmem:[%s1280_s3 + $0xc8] sm:$0xff] %vm498_vm4, %v469_v43  ;;  %552 = vst.msk [vmem:[%s1280_s3 + $0x1a8] sm:$0xff] %vm498_vm4, %v497_v44 }
 0x144   :  { %v333_v45 = vpop.f32.mrb[52].mxu0 }
 0x145   :  { %v334_v46 = vadd.f32 %v1005_v26, %v333_v45  ;;  %v669_v47 = vpop.f32.mrb[53].mxu0 }
 0x146   :  { %v336_v48 = vpop.f32.mrb[54].mxu0 }
 0x147   :  { %v470_v49 = vmax.f32 %v334_v46, 0.0  ;;  %v337_v50 = vadd.f32 %v1005_v26, %v336_v48  ;;  %v670_v51 = vpop.f32.mrb[55].mxu0 }
 0x149   :  { %525 = vst.msk [vmem:[%s1280_s3 + $0xd0] sm:$0xff] %vm498_vm4, %v470_v49  ;;  %v471_v52 = vmax.f32 %v337_v50, 0.0 }
 0x14b   :  { %526 = vst.msk [vmem:[%s1280_s3 + $0xd8] sm:$0xff] %vm498_vm4, %v471_v52 }

</bundles_post_ra>
